<compile_context>
chip_gen: v6e
topology: v6e:2x2x1
jax: 0.10.0
libtpu: 0.0.40
codegen_flags: <defaults>
</compile_context>

<pallas_src>
import functools
import math

import jax
import jax.numpy as jnp
import numpy as np
from jax.experimental import pallas as pl
from jax.experimental.pallas import tpu as pltpu


# ----------------------------------------------------------------------------
# Pallas kernel
# ----------------------------------------------------------------------------
def _cp_embedding_kernel(x_ref, tab_ref, pe_ref, o_ref, *, n_ids):
    """One grid step = one (batch, seq-tile) slab of packed rows.

    x_ref  : (tile_s, n_ids)   int32   pre-offset token ids (disjoint ranges)
    tab_ref: (K_tot, d_out)    f32/bf16 fused (scale*table@W), block-diagonal if packed
    pe_ref : (tile_s, d_out)   f32     positional encoding + bias (packed rows)
    o_ref  : (tile_s, d_out)   f32
    """
    tile_s = x_ref.shape[0]
    k_tot = tab_ref.shape[0]

    ids = x_ref[...]                                           # (tile_s, n_ids)
    iota = jax.lax.broadcasted_iota(jnp.int32, (tile_s, k_tot), 1)

    # Multi-hot selection: every id lands in a disjoint column range (ids were
    # offset in the wrapper), so bool-OR of the compare masks is exact.
    mask = iota == ids[:, 0:1]
    for a in range(1, n_ids):
        mask = mask | (iota == ids[:, a:a + 1])
    onehot = mask.astype(tab_ref.dtype)                        # single cast

    # Single gather matmul on the MXU; f32 accumulation.
    proj = jnp.dot(onehot, tab_ref[...], preferred_element_type=jnp.float32)
    o_ref[...] = (proj + pe_ref[...]).astype(o_ref.dtype)


# ----------------------------------------------------------------------------
# Wrapper
# ----------------------------------------------------------------------------
def _round_up(x, m):
    return (x + m - 1) // m * m


def _pick_tile_s(s_packed):
    # Largest aligned tile that divides the packed sequence length; per-step
    # VMEM stays small (d_out <= ~128 lanes) so big tiles amortize the ~0.35us
    # per-grid-step overhead.
    for cand in (2048, 1024, 512, 256, 128, 64, 32, 16, 8):
        if s_packed % cand == 0:
            return cand
    return s_packed  # full-extent block (always legal)


def cp_embedding_forward(x_tokens, tables, scales, W, b, pe, *,
                         tile_s=None, matmul_dtype=jnp.float32):
    """Fused CPEmbedding forward.

    x_tokens: (B, S, A) int32, x_tokens[..., i] in [0, n_tokens_i)
    tables  : list of (n_tok_i, d_emb_i) f32 embedding tables
    scales  : list of sqrt(d_emb_i)
    W       : (sum_emb_dims, d_model) f32 (torch weight transposed; pass identity
              if the module has proj=None, i.e. d_model == sum_emb_dims)
    b       : (1, d_model) f32
    pe      : (>=S, d_model) f32 sinusoidal positional encoding
    """
    B, S, A = x_tokens.shape
    d_model = W.shape[1]
    assert len(tables) == A
    hi = jax.lax.Precision.HIGHEST

    # --- constant folding over weights (wrapper-side, traced once) ----------
    fused_rows, attr_offsets = [], []
    off_tok, off_emb = 0, 0
    for t, s in zip(tables, scales):
        n_tok, d_k = t.shape
        fused_rows.append(
            jnp.matmul(jnp.float32(s) * t, W[off_emb:off_emb + d_k, :],
                       precision=hi))
        attr_offsets.append(off_tok)
        off_tok += n_tok
        off_emb += d_k
    assert off_emb == W.shape[0]
    fused = jnp.concatenate(fused_rows, axis=0)              # (off_tok, d_model)

    # --- lane-dense 2-row packing --------------------------------------------
    pack = 2 if (2 * d_model <= 128 and S % 2 == 0) else 1
    k_half = _round_up(max(off_tok, 1), 128)
    k_tot = pack * k_half
    d_out = pack * d_model
    s_packed = S // pack
    n_ids = pack * A

    tab_half = jnp.pad(fused, ((0, k_half - off_tok), (0, 0)))
    if pack == 2:
        zeros = jnp.zeros_like(tab_half)
        tab = jnp.concatenate(
            [jnp.concatenate([tab_half, zeros], axis=1),
             jnp.concatenate([zeros, tab_half], axis=1)], axis=0)   # (256, 128)-style
    else:
        tab = tab_half
    tab = tab.astype(matmul_dtype)

    # bias folded into pe; packed rows; SHARED across batch (not replicated).
    pe_b = pe[:S].astype(jnp.float32) + b.astype(jnp.float32).reshape(1, d_model)
    pe_packed = pe_b.reshape(s_packed, d_out)                 # contiguous reshape

    # token ids: cumulative-vocab offsets (+ k_half for the odd packed row)
    x_off = (x_tokens.astype(jnp.int32)
             + jnp.asarray(attr_offsets, jnp.int32)[None, None, :])
    if pack == 2:
        parity = (jnp.arange(S, dtype=jnp.int32) % 2) * k_half
        x_off = x_off + parity[None, :, None]
    x_packed = x_off.reshape(B, s_packed, n_ids)              # contiguous reshape

    if tile_s is None:
        tile_s = _pick_tile_s(s_packed)
    assert s_packed % tile_s == 0
    grid = (s_packed // tile_s, B)   # batch innermost -> pe/table blocks stay resident

    kernel = functools.partial(_cp_embedding_kernel, n_ids=n_ids)

    itemsize = jnp.dtype(matmul_dtype).itemsize
    cost = pl.CostEstimate(
        flops=2 * B * s_packed * k_tot * d_out,
        transcendentals=0,
        bytes_accessed=(B * s_packed * n_ids * 4            # ids
                        + k_tot * d_out * itemsize           # fused table
                        + s_packed * d_out * 4               # pe (read once)
                        + B * s_packed * d_out * 4))         # output

    out_packed = pl.pallas_call(
        kernel,
        out_shape=jax.ShapeDtypeStruct((B, s_packed, d_out), jnp.float32),
        grid=grid,
        in_specs=[
            pl.BlockSpec((None, tile_s, n_ids), lambda st, bb: (bb, st, 0)),
            pl.BlockSpec((k_tot, d_out), lambda st, bb: (0, 0)),
            pl.BlockSpec((tile_s, d_out), lambda st, bb: (st, 0)),
        ],
        out_specs=pl.BlockSpec((None, tile_s, d_out), lambda st, bb: (bb, st, 0)),
        compiler_params=pltpu.CompilerParams(
            dimension_semantics=("parallel", "arbitrary")),
        cost_estimate=cost,
    )(x_packed, tab, pe_packed)

    # (B, S/2, 2*d_model) -> (B, S, d_model) is a free contiguous reshape.
    return out_packed.reshape(B, S, d_model)


# ----------------------------------------------------------------------------
# Pure-JAX reference (mirrors the PyTorch forward, eval mode)
# ----------------------------------------------------------------------------
def cp_embedding_reference(x_tokens, tables, scales, W, b, pe):
    embs = [tables[i][x_tokens[..., i]] * scales[i] for i in range(len(tables))]
    embs = jnp.concatenate(embs, axis=-1)
    embs = jnp.matmul(embs, W, precision=jax.lax.Precision.HIGHEST) + b
    return embs + pe[None, :x_tokens.shape[1], :]


# ----------------------------------------------------------------------------
# Parameter construction (deterministic, synthetic)
# ----------------------------------------------------------------------------
def make_positional_encoding(d_model, max_len):
    pe = np.zeros((max_len, d_model), dtype=np.float32)
    position = np.arange(0, max_len, dtype=np.float32)[:, None]
    div_term = np.exp(np.arange(0, d_model, 2).astype(np.float32)
                      * (-math.log(10000.0) / d_model))
    pe[:, 0::2] = np.sin(position * div_term)
    pe[:, 1::2] = np.cos(position * div_term)
    return jnp.asarray(pe)


if __name__ == "__main__":
    config = {
        "attributes": ["tempo", "chord", "pitch", "duration"],
        "n_tokens": {"tempo": 16, "chord": 24, "pitch": 40, "duration": 12},
        "emb_dims": {"tempo": 32, "chord": 32, "pitch": 48, "duration": 16},
        "d_model": 64,
        "max_len": 512,
        "dropout": 0.1,
    }
    B, S = 2, 16
    attrs = config["attributes"]
    A = len(attrs)
    sum_emb = sum(config["emb_dims"].values())
    d_model = config["d_model"]
    assert d_model != sum_emb  # proj layer exists

    key = jax.random.PRNGKey(0)
    keys = jax.random.split(key, A + 3)

    # embedding tables (nn.Embedding default init ~ N(0, 1))
    tables, scales = [], []
    for i, k in enumerate(attrs):
        n_tok = config["n_tokens"][k]
        d_emb = config["emb_dims"][k]
        tables.append(jax.random.normal(keys[i], (n_tok, d_emb), jnp.float32))
        scales.append(math.sqrt(d_emb))

    # projection Linear(sum_emb -> d_model): torch weight is (d_model, sum_emb);
    # we store W = weight.T so the math is embs @ W + b.
    bound = 1.0 / math.sqrt(sum_emb)
    W = jax.random.uniform(keys[A], (sum_emb, d_model), jnp.float32, -bound, bound)
    b = jax.random.uniform(keys[A + 1], (1, d_model), jnp.float32, -bound, bound)

    # positional encoding, sliced to the sequence length used
    pe = make_positional_encoding(d_model, config["max_len"])[:S]

    # token inputs: x[..., i] in [0, n_tokens[attr_i])
    tok_keys = jax.random.split(keys[A + 2], A)
    tok_cols = [
        jax.random.randint(tok_keys[i], (B, S), 0, config["n_tokens"][k], jnp.int32)
        for i, k in enumerate(attrs)
    ]
    x_tokens = jnp.stack(tok_cols, axis=-1)  # (B, S, A) int32

    out = cp_embedding_forward(x_tokens, tables, scales, W, b, pe)
    out = jax.block_until_ready(out)

    ref = cp_embedding_reference(x_tokens, tables, scales, W, b, pe)
    np.testing.assert_allclose(np.asarray(out), np.asarray(ref), rtol=1e-5, atol=1e-5)

    print("KERNEL_OK")
</pallas_src>

<mosaic_0001>
module attributes {stable_mosaic.version = 11 : i64} {
  func.func @_cp_embedding_kernel(%arg0: i32, %arg1: i32, %arg2: memref<1x8x8xi32, #tpu.memory_space<vmem>>, %arg3: memref<256x128xf32, #tpu.memory_space<vmem>>, %arg4: memref<8x128xf32, #tpu.memory_space<vmem>>, %arg5: memref<1x8x128xf32, #tpu.memory_space<vmem>>) attributes {dimension_semantics = [#tpu.dimension_semantics<parallel>, #tpu.dimension_semantics<arbitrary>], iteration_bounds = array<i64: 1, 2>, scalar_prefetch = 0 : i64, scratch_operands = 0 : i64, tpu.core_type = #tpu.core_type<tc>, window_params = [{transform_indices = @transform_0, window_bounds = array<i64: 1, 8, 8>}, {pipeline_mode = #tpu.pipeline_mode<synchronous>, transform_indices = @transform_1, window_bounds = array<i64: 256, 128>}, {transform_indices = @transform_2, window_bounds = array<i64: 8, 128>}, {transform_indices = @transform_3, window_bounds = array<i64: 1, 8, 128>}]} {
    %c0 = arith.constant 0 : index
    %c0_0 = arith.constant 0 : index
    %c0_1 = arith.constant 0 : index
    %0 = vector.load %arg2[%c0, %c0_0, %c0_1] : memref<1x8x8xi32, #tpu.memory_space<vmem>>, vector<1x8x8xi32>
    %1 = vector.shape_cast %0 : vector<1x8x8xi32> to vector<8x8xi32>
    %2 = tpu.iota {dimensions = array<i32: 1>} : vector<8x256xi32>
    %3 = vector.extract_strided_slice %1 {offsets = [0, 0], sizes = [8, 1], strides = [1, 1]} : vector<8x8xi32> to vector<8x1xi32>
    %4 = vector.broadcast %3 : vector<8x1xi32> to vector<8x256xi32>
    %5 = arith.cmpi eq, %2, %4 : vector<8x256xi32>
    %6 = vector.extract_strided_slice %1 {offsets = [0, 1], sizes = [8, 1], strides = [1, 1]} : vector<8x8xi32> to vector<8x1xi32>
    %7 = vector.broadcast %6 : vector<8x1xi32> to vector<8x256xi32>
    %8 = arith.cmpi eq, %2, %7 : vector<8x256xi32>
    %9 = arith.ori %5, %8 : vector<8x256xi1>
    %10 = vector.extract_strided_slice %1 {offsets = [0, 2], sizes = [8, 1], strides = [1, 1]} : vector<8x8xi32> to vector<8x1xi32>
    %11 = vector.broadcast %10 : vector<8x1xi32> to vector<8x256xi32>
    %12 = arith.cmpi eq, %2, %11 : vector<8x256xi32>
    %13 = arith.ori %9, %12 : vector<8x256xi1>
    %14 = vector.extract_strided_slice %1 {offsets = [0, 3], sizes = [8, 1], strides = [1, 1]} : vector<8x8xi32> to vector<8x1xi32>
    %15 = vector.broadcast %14 : vector<8x1xi32> to vector<8x256xi32>
    %16 = arith.cmpi eq, %2, %15 : vector<8x256xi32>
    %17 = arith.ori %13, %16 : vector<8x256xi1>
    %18 = vector.extract_strided_slice %1 {offsets = [0, 4], sizes = [8, 1], strides = [1, 1]} : vector<8x8xi32> to vector<8x1xi32>
    %19 = vector.broadcast %18 : vector<8x1xi32> to vector<8x256xi32>
    %20 = arith.cmpi eq, %2, %19 : vector<8x256xi32>
    %21 = arith.ori %17, %20 : vector<8x256xi1>
    %22 = vector.extract_strided_slice %1 {offsets = [0, 5], sizes = [8, 1], strides = [1, 1]} : vector<8x8xi32> to vector<8x1xi32>
    %23 = vector.broadcast %22 : vector<8x1xi32> to vector<8x256xi32>
    %24 = arith.cmpi eq, %2, %23 : vector<8x256xi32>
    %25 = arith.ori %21, %24 : vector<8x256xi1>
    %26 = vector.extract_strided_slice %1 {offsets = [0, 6], sizes = [8, 1], strides = [1, 1]} : vector<8x8xi32> to vector<8x1xi32>
    %27 = vector.broadcast %26 : vector<8x1xi32> to vector<8x256xi32>
    %28 = arith.cmpi eq, %2, %27 : vector<8x256xi32>
    %29 = arith.ori %25, %28 : vector<8x256xi1>
    %30 = vector.extract_strided_slice %1 {offsets = [0, 7], sizes = [8, 1], strides = [1, 1]} : vector<8x8xi32> to vector<8x1xi32>
    %31 = vector.broadcast %30 : vector<8x1xi32> to vector<8x256xi32>
    %32 = arith.cmpi eq, %2, %31 : vector<8x256xi32>
    %33 = arith.ori %29, %32 : vector<8x256xi1>
    %34 = arith.extui %33 : vector<8x256xi1> to vector<8x256xi32>
    %35 = arith.sitofp %34 : vector<8x256xi32> to vector<8x256xf32>
    %c0_2 = arith.constant 0 : index
    %c0_3 = arith.constant 0 : index
    %36 = vector.load %arg3[%c0_2, %c0_3] : memref<256x128xf32, #tpu.memory_space<vmem>>, vector<256x128xf32>
    %cst = arith.constant dense<0.000000e+00> : vector<8x128xf32>
    %37 = tpu.matmul %35, %36, %cst {dimension_numbers = #tpu.dot_dimension_numbers<[1], [0], [0], [1], [0, 0, 1, 1], [], []>} : vector<8x256xf32>, vector<256x128xf32>, vector<8x128xf32> -> vector<8x128xf32>
    %c0_4 = arith.constant 0 : index
    %c0_5 = arith.constant 0 : index
    %38 = vector.load %arg4[%c0_4, %c0_5] : memref<8x128xf32, #tpu.memory_space<vmem>>, vector<8x128xf32>
    %39 = arith.addf %37, %38 : vector<8x128xf32>
    %c0_6 = arith.constant 0 : index
    %c0_7 = arith.constant 0 : index
    %c0_8 = arith.constant 0 : index
    %40 = vector.load %arg5[%c0_6, %c0_7, %c0_8] : memref<1x8x128xf32, #tpu.memory_space<vmem>>, vector<1x8x128xf32>
    %41 = vector.shape_cast %40 : vector<1x8x128xf32> to vector<8x128xf32>
    %42 = vector.shape_cast %39 : vector<8x128xf32> to vector<1x8x128xf32>
    tpu.vector_store %arg5[%c0_6, %c0_7, %c0_8], %42 {strides = array<i32>} : memref<1x8x128xf32, #tpu.memory_space<vmem>>, vector<1x8x128xf32>,
    return
  }
  func.func @transform_0(%arg0: i32, %arg1: i32) -> (i32, i32, i32) {
    %c0_i32 = arith.constant 0 : i32
    %c0_i32_0 = arith.constant 0 : i32
    return %arg1, %arg0, %c0_i32 : i32, i32, i32
  }
  func.func @transform_1(%arg0: i32, %arg1: i32) -> (i32, i32) {
    %c0_i32 = arith.constant 0 : i32
    %c0_i32_0 = arith.constant 0 : i32
    %c0_i32_1 = arith.constant 0 : i32
    return %c0_i32, %c0_i32_0 : i32, i32
  }
  func.func @transform_2(%arg0: i32, %arg1: i32) -> (i32, i32) {
    %c0_i32 = arith.constant 0 : i32
    %c0_i32_0 = arith.constant 0 : i32
    return %arg0, %c0_i32 : i32, i32
  }
  func.func @transform_3(%arg0: i32, %arg1: i32) -> (i32, i32, i32) {
    %c0_i32 = arith.constant 0 : i32
    %c0_i32_0 = arith.constant 0 : i32
    return %arg1, %arg0, %c0_i32 : i32, i32, i32
  }
}

</mosaic_0001>

<bundles_post_ra>
// kernel: tpu_custom_call.1
= control target key start
LH: loop header
LB: loop body
LE: loop exit
PB: predicated region body
PF: predicated region fallthrough
CT: control target
= control target key end

     0   :  { %8 = vsyncpa [#allocation3], 0  ;;  %s1055_s0 = inlined_call_operand.hbm [shape: s32[2,8,8], index: 0, kind: input, shape index: {}]   ;;  %s1056_s1 = inlined_call_operand.hbm [shape: f32[256,128], index: 1, kind: input, shape index: {}]   ;;  %s1057_s2 = inlined_call_operand.hbm [shape: f32[8,128], index: 2, kind: input, shape index: {}]   ;;  %s1058_s3 = inlined_call_operand.hbm [shape: f32[2,8,128], index: 3, kind: output, shape index: {}]  }
   0x1   :  { %10 = vsyncpa [#allocation3 + $0x1], 0 }
   0x2   :  { %11 = vsyncpa [#allocation6], 0 }
   0x3   :  { %12 = vsyncpa [#allocation4], 0 }
   0x4   :  { %14 = vsyncpa [#allocation4 + $0x1], 0  ;;  %s877_s12 = smov 0   ;;  %s879_s13 = smov 0  }
   0x5   :  { %s881_s14 = smov 0   ;;  %s883_s15 = smov 0  }
   0x6   :  { %s885_s16 = smov 0   ;;  %s887_s17 = smov 0  }
   0x7 LB: > { %s519_s18 = sadd.s32 4294967295, %s840_s17   ;;  %s520_s19 = sadd.s32 4294967294, %s840_s17   ;;  %s840_s17 = sphi %s887_s17, %s20_s17   ;;  %s836_s16 = sphi %s885_s16, %s1078_s16   ;;  %s832_s15 = sphi %s883_s15, %s1077_s15   ;;  %s828_s14 = sphi %s881_s14, %s1076_s14   ;;  %s824_s13 = sphi %s879_s13, %s1075_s13   ;;  %s820_s12 = sphi %s877_s12, %s1074_s12  }
   0x8   : > { %p54_p0 = scmp.ne.s32.totalorder %s824_s13, %s820_s12  ;;  %p911_p1 = scmp.eq.s32.totalorder %s519_s18, 0 }
   0x9   : > { %p915_p2 = scmp.eq.s32.totalorder %s519_s18, 1  ;;  %p133_p3 = scmp.eq.s32.totalorder %s520_s19, 1 }
   0xa   : > { %s1062_s20 = scalar_select %p911_p1, 1, 0 }
   0xb   : > { %p921_p4 = por %p911_p1, %p54_p0  ;;  %p521_p5 = scmp.ge.s32.totalorder %s840_s17, 1 }
   0xc   : > { %p926_p6 = por %p133_p3, %p54_p0  ;;  %p140_p7 = scmp.lt.s32.totalorder %s840_s17, 3 }
   0xd   : > { %s1064_s22 = scalar_select %p921_p4, 1, 0 }
   0xe   : > { %s1065_s23 = scalar_select %p926_p6, 1, 0 }
   0xf   : > { %p931_p8 = pnand %p521_p5, %p140_p7  ;;  %s842_s25 = smov [#allocation5]  }
  0x10   : > { %s152_s26 = sshll.u32 %s842_s25, 4  ;;  %s843_s28 = smov [#allocation7]   ;;  %s153_s26 = int_to_ptr.vmem [resolvable:$true] %s152_s26 }
  0x11   : > { %p585_p9 = pneg %p931_p8  ;;  %s168_s29 = sshll.u32 %s843_s28, 4  ;;  %s169_s29 = int_to_ptr.vmem [resolvable:$true] %s168_s29 }
  0x12   : > { %s687_s30 = scalar_lea.vmem %s153_s26, 4096  ;;  %p695_p5 = scmp.lt.s32.totalorder %s153_s26, %s153_s26 }
  0x13   : > { %p940_p11 = pnand %p585_p9, %p911_p1  ;;  %p688_p13 = scmp.ne.s32.totalorder %s153_s26, %s687_s30 }
  0x14   : > { %p696_p7 = scmp.lt.s32.totalorder %s687_s30, %s687_s30 }
  0x15   : > { %p678_p12 = pneg %p940_p11 }
  0x16   : > { %p697_p10 = por %p696_p7, %p695_p5 }
  0x17   : > { %p690_p0 = pnand %p688_p13, %p678_p12 }
  0x19   : > { %p691_p3 = pneg %p690_p0 }
  0x1b   : > { %p698_p9 = pnand %p697_p10, %p691_p3 }
  0x1d   : > { %701 = shalt.err (!%p698_p9)
}
  0x1e   : > { %s844_s4 = smov 128   ;;  %s845_s5 = smov 8  }
  0x1f   : > { %588 = dma.hbm_to_vmem [thread:$0]  (!%p940_p11), %s1056_s1, 4096, %s153_s26, [#allocation6], %s844_s4, %s844_s4, %s845_s5  }
  0x20   : > { %s713_s8 = scalar_lea.vmem %s169_s29, 128  ;;  %p721_p1 = scmp.lt.s32.totalorder %s169_s29, %s169_s29 }
  0x21   : > { %p714_p6 = scmp.ne.s32.totalorder %s169_s29, %s713_s8  ;;  %p722_p4 = scmp.lt.s32.totalorder %s713_s8, %s713_s8 }
  0x23   : > { %p716_p13 = pnand %p714_p6, %p678_p12  ;;  %p723_p5 = por %p722_p4, %p721_p1 }
  0x25   : > { %p717_p0 = pneg %p716_p13 }
  0x27   : > { %p724_p10 = pnand %p723_p5, %p717_p0 }
  0x29   : > { %727 = shalt.err (!%p724_p10)
}
  0x2a   : > { %591 = dma.hbm_to_vmem [thread:$0]  (!%p940_p11), %s1057_s2, 128, %s169_s29, [#allocation6]  }
  0x2b   : > { %s29_s11 = sadd.s32 1, %s836_s16  ;;  %s41_s18 = sadd.s32 1, %s828_s14 }
  0x2c   : > { %p30_p1 = scmp.ge.s32.totalorder %s29_s11, 2  ;;  %p48_p4 = scmp.ne.s32.totalorder %s828_s14, %s824_s13 }
  0x2d   : > { %p49_p6 = scmp.eq.s32.totalorder %s840_s17, 0  ;;  %p602_p12 = scmp.lt.s32.totalorder %s840_s17, 2 }
  0x2e   : > { %s1080_s11 = smov (%p30_p1, %s29_s11), 0  ;;  %p972_p7 = por %p915_p2, %p48_p4 }
  0x2f   : > { %p50_p3 = por %p49_p6, %p48_p4  ;;  %s36_s25 = ssub.s32 %s836_s16, %s1080_s11 }
  0x30   : > { %s179_s26 = sand.u32 1, %s828_s14   ;;  %p39_p9 = scmp.eq.s32.totalorder %s36_s25, 0 }
  0x31   : > { %s525_s27 = sshll.u32 %s179_s26, 3  ;;  %s526_s28 = sshll.u32 %s836_s16, 7 }
  0x32   : > { %s981_s29 = scalar_select %p39_p9, %s828_s14, %s41_s18  }
  0x33   : > { %s189_s5 = scalar_lea.hbm %s1055_s0, %s526_s28  ;;  %s183_s6 = scalar_lea.vmem [#allocation2], %s525_s27 }
  0x34   : > { %s191_s7 = sshll.u32 %s183_s6, 4  ;;  %p988_p11 = pnand %p602_p12, %p50_p3  ;;  %s192_s7 = int_to_ptr.vmem [resolvable:$true] %s191_s7 }
  0x35   : > { %s180_s8 = scalar_lea.sflag [#allocation3], %s179_s26  ;;  %s741_s9 = scalar_lea.vmem %s192_s7, 128 }
  0x36   : > { %p730_p2 = pneg %p988_p11  ;;  %p742_p13 = scmp.ne.s32.totalorder %s192_s7, %s741_s9 }
  0x37   : > { %s846_s10 = smov [#allocation2]  }
  0x38   : > { %p744_p0 = pnand %p742_p13, %p730_p2  ;;  %s746_s18 = sshll.u32 %s846_s10, 4  ;;  %s747_s18 = int_to_ptr.vmem [resolvable:$false] %s746_s18 }
  0x39   : > { %s748_s25 = scalar_lea.vmem %s747_s18, 256  ;;  %p749_p10 = scmp.lt.s32.totalorder %s192_s7, %s747_s18 }
  0x3a   : > { %p745_p5 = pneg %p744_p0  ;;  %p750_p1 = scmp.lt.s32.totalorder %s748_s25, %s741_s9 }
  0x3c   : > { %p751_p4 = por %p750_p1, %p749_p10 }
  0x3e   : > { %p752_p6 = pnand %p751_p4, %p745_p5 }
  0x40   : > { %755 = shalt.err (!%p752_p6)
}
  0x41   : > { %595 = dma.hbm_to_vmem [thread:$0]  (!%p988_p11), %s189_s5, 128, %s192_s7, %s180_s8  }
  0x42   : > { %200 = sbr.rel (%p931_p8) target bundleno = 438 (0x1b6), region = 32  ;;  %s999_s26 = sand.u32 (!%p931_p8), 1, %s824_s13  }
  0x43   : > { %s528_s27 = sshll.u32 (!%p931_p8), %s999_s26, 3  ;;  %s203_s28 = scalar_lea.sflag (!%p931_p8), [#allocation3], %s999_s26 }
  0x44   : > { %s206_s30 = scalar_lea.vmem (!%p931_p8), [#allocation2], %s528_s27  ;;  %p1070_p12 = scmp.ne.s32.totalorder (!%p931_p8), %s1064_s22, 0 }
  0x47   : > { %807 = dma.done.wait (%p1070_p12), %s203_s28, 128  }
  0x48   : > { %809 = vsyncadd (%p1070_p12), %s203_s28, 4294967168  ;;  %p1071_p3 = scmp.ne.s32.totalorder %s1062_s20, 0 }
  0x4a   : > { %811 = dma.done.wait (%p1071_p3), [#allocation6], 4224  }
  0x4b   : > { %813 = vsyncadd (%p1071_p3), [#allocation6], 4294963072  ;;  %v847_v0 = vmov 2   ;;  %v848_v1 = vmov 0   ;;  %v237_v2 = vld [vmem:[%s206_s30] sm:$0xff]  ;;  %v849_v7 = vmov 3   ;;  %v238_v41 = vlaneseq }
  0x4c   : > { %669 = vset.pattern.permute.xlu1 %v847_v0  ;;  %667 = vset.pattern.permute.xlu0 %v848_v1  ;;  %v330_v3 = vld [vmem:[#allocation5 + $0xf8] sm:$0xff]  ;;  %v329_v5 = vld [vmem:[#allocation5 + $0xf0] sm:$0xff]  ;;  %v850_v8 = vmov 1   ;;  %v328_v9 = vld [vmem:[#allocation5 + $0xe8] sm:$0xff]  ;;  %v851_v12 = vmov 4   ;;  %v852_v13 = vmov 5  }
  0x4d   : > { %v314_v4 = vld [vmem:[#allocation5 + $0x78] sm:$0xff]  ;;  %254 = vperm.xlu1 %669, %v237_v2   ;;  %242 = vperm.xlu0 %667, %v237_v2   ;;  %v313_v6 = vld [vmem:[#allocation5 + $0x70] sm:$0xff]  ;;  %v312_v10 = vld [vmem:[#allocation5 + $0x68] sm:$0xff]  ;;  %v853_v19 = vmov 6   ;;  %v854_v23 = vmov 7   ;;  %v239_v42 = vand.u32 127, %v238_v41 }
  0x4e   : > { %538 = vmatprep.subr.mxu0 %v330_v3  ;;  %v327_v11 = vld [vmem:[#allocation5 + $0xe0] sm:$0xff]  ;;  %v326_v15 = vld [vmem:[#allocation5 + $0xd8] sm:$0xff]  ;;  %v325_v17 = vld [vmem:[#allocation5 + $0xd0] sm:$0xff]  ;;  %v855_v52 = vmov 0.0   ;;  %s535_s20 = sshll.u32 %s832_s15, 7  ;;  %s236_s22 = scalar_lea.vmem [#allocation8], %s528_s27 }
  0x4f   : > { %539 = vmatpush3.msra.mxu0 %v314_v4  ;;  %v311_v14 = vld [vmem:[#allocation5 + $0x60] sm:$0xff]  ;;  %v310_v16 = vld [vmem:[#allocation5 + $0x58] sm:$0xff]  ;;  %v309_v18 = vld [vmem:[#allocation5 + $0x50] sm:$0xff]  ;;  %v240_v45 = vadd.s32 128, %v239_v42  ;;  %s418_s24 = sshll.u32 %s236_s22, 4  ;;  %s416_s6 = scalar_lea.hbm %s1058_s3, %s535_s20  ;;  %s419_s24 = int_to_ptr.vmem [resolvable:$true] %s418_s24 }
  0x50   : > { %540 = vmatprep.subr.mxu0 %v329_v5  ;;  %v324_v20 = vld [vmem:[#allocation5 + $0xc8] sm:$0xff]  ;;  %v323_v22 = vld [vmem:[#allocation5 + $0xc0] sm:$0xff]  ;;  %v322_v25 = vld [vmem:[#allocation5 + $0xb8] sm:$0xff]  ;;  %s404_s7 = scalar_lea.sflag [#allocation4], %s999_s26  ;;  %s756_s21 = scalar_lea.vmem %s419_s24, 128 }
  0x51   : > { %670 = vset.pattern.permute.xlu1 %v849_v7  ;;  %668 = vset.pattern.permute.xlu0 %v850_v8  ;;  %v308_v21 = vld [vmem:[#allocation5 + $0x48] sm:$0xff]  ;;  %v307_v24 = vld [vmem:[#allocation5 + $0x40] sm:$0xff]  ;;  %v306_v26 = vld [vmem:[#allocation5 + $0x38] sm:$0xff]  ;;  %p757_p8 = scmp.ne.s32.totalorder %s419_s24, %s756_s21  ;;  %s856_s8 = smov [#allocation8]  }
  0x52   : > { %261 = vperm.xlu1 %670, %v237_v2   ;;  %247 = vperm.xlu0 %668, %v237_v2   ;;  %v321_v27 = vld [vmem:[#allocation5 + $0xb0] sm:$0xff]  ;;  %v320_v29 = vld [vmem:[#allocation5 + $0xa8] sm:$0xff]  ;;  %v319_v31 = vld [vmem:[#allocation5 + $0xa0] sm:$0xff]  ;;  %s760_s9 = sshll.u32 %s856_s8, 4  ;;  %s761_s9 = int_to_ptr.vmem [resolvable:$false] %s760_s9 }
  0x53   : > { %541 = vmatpush3.msra.mxu0 %v313_v6  ;;  %v305_v28 = vld [vmem:[#allocation5 + $0x30] sm:$0xff]  ;;  %v304_v30 = vld [vmem:[#allocation5 + $0x28] sm:$0xff]  ;;  %v303_v32 = vld [vmem:[#allocation5 + $0x20] sm:$0xff]  ;;  %p758_p9 = pnand %p757_p8, %p972_p7  ;;  %s762_s15 = scalar_lea.vmem %s761_s9, 256 }
  0x54   : > { %542 = vmatprep.subr.mxu0 %v328_v9  ;;  %v318_v33 = vld [vmem:[#allocation5 + $0x98] sm:$0xff]  ;;  %v317_v35 = vld [vmem:[#allocation5 + $0x90] sm:$0xff]  ;;  %v316_v37 = vld [vmem:[#allocation5 + $0x88] sm:$0xff]  ;;  %p763_p2 = scmp.lt.s32.totalorder %s419_s24, %s761_s9  ;;  %p764_p13 = scmp.lt.s32.totalorder %s762_s15, %s756_s21 }
  0x55   : > { %543 = vmatpush3.msra.mxu0 %v312_v10  ;;  %v302_v34 = vld [vmem:[#allocation5 + $0x18] sm:$0xff]  ;;  %v301_v36 = vld [vmem:[#allocation5 + $0x10] sm:$0xff]  ;;  %v300_v38 = vld [vmem:[#allocation5 + $0x8] sm:$0xff]  ;;  %p759_p11 = pneg %p758_p9 }
  0x56   : > { %671 = vset.pattern.permute.xlu1 %v851_v12  ;;  %672 = vset.pattern.permute.xlu0 %v852_v13  ;;  %v315_v39 = vld [vmem:[#allocation5 + $0x80] sm:$0xff]  ;;  %p765_p0 = por %p764_p13, %p763_p2 }
  0x57   : > { %268 = vperm.xlu1 %671, %v237_v2   ;;  %275 = vperm.xlu0 %672, %v237_v2   ;;  %v299_v40 = vld [vmem:[#allocation5] sm:$0xff] }
  0x58   : > { %544 = vmatprep.subr.mxu0 %v327_v11  ;;  %v331_v56 = vld [vmem:[#allocation7] sm:$0xff]  ;;  %p766_p5 = pnand %p765_p0, %p759_p11 }
  0x59   : > { %545 = vmatpush3.msra.mxu0 %v311_v14 }
  0x5a   : > { %546 = vmatprep.subr.mxu0 %v326_v15 }
  0x5b   : > { %673 = vset.pattern.permute.xlu1 %v853_v19  ;;  %547 = vmatpush3.msra.mxu0 %v310_v16 }
  0x5c   : > { %282 = vperm.xlu1 %673, %v237_v2   ;;  %548 = vmatprep.subr.mxu0 %v325_v17 }
  0x5d   : > { %549 = vmatpush3.msra.mxu0 %v309_v18  ;;  %675 = vset.pattern.permute.xlu0 %v854_v23 }
  0x5e   : > { %550 = vmatprep.subr.mxu0 %v324_v20 }
  0x5f   : > { %551 = vmatpush3.msra.mxu0 %v308_v21 }
  0x60   : > { %674 = vset.pattern.permute.xlu1 %v854_v23  ;;  %552 = vmatprep.subr.mxu0 %v323_v22 }
  0x61   : > { %289 = vperm.xlu1 %674, %v237_v2   ;;  %553 = vmatpush3.msra.mxu0 %v307_v24 }
  0x62   : > { %554 = vmatprep.subr.mxu0 %v322_v25 }
  0x63   : > { %555 = vmatpush3.msra.mxu0 %v306_v26 }
  0x64   : > { %556 = vmatprep.subr.mxu0 %v321_v27 }
  0x65   : > { %557 = vmatpush3.msra.mxu0 %v305_v28 }
  0x66   : > { %558 = vmatprep.subr.mxu0 %v320_v29 }
  0x67   : > { %559 = vmatpush3.msra.mxu0 %v304_v30 }
  0x68   : > { %560 = vmatprep.subr.mxu0 %v319_v31 }
  0x69   : > { %561 = vmatpush3.msra.mxu0 %v303_v32 }
  0x6a   : > { %562 = vmatprep.subr.mxu0 %v318_v33 }
  0x6b   : > { %563 = vmatpush3.msra.mxu0 %v302_v34 }
  0x6c   : > { %564 = vmatprep.subr.mxu0 %v317_v35 }
  0x6d   : > { %565 = vmatpush3.msra.mxu0 %v301_v36 }
  0x6e   : > { %566 = vmatprep.subr.mxu0 %v316_v37 }
  0x6f   : > { %567 = vmatpush3.msra.mxu0 %v300_v38 }
  0x70   : > { %568 = vmatprep.subr.mxu0 %v315_v39 }
  0x71   : > { %569 = vmatpush3.msra.mxu0 %v299_v40 }
  0xc8   : > { %v255_v43 = vpop.permute.xlu1 %254  ;;  %v243_v44 = vpop.permute.xlu0 %242 }
  0xc9   : > { %vm244_vm0 = vcmp.eq.s32.totalorder %v239_v42, %v243_v44  ;;  %vm245_vm1 = vcmp.eq.s32.totalorder %v240_v45, %v243_v44  ;;  %vm256_vm6 = vcmp.eq.s32.totalorder %v239_v42, %v255_v43  ;;  %vm257_vm7 = vcmp.eq.s32.totalorder %v240_v45, %v255_v43 }
  0xcd   : > { %v262_v46 = vpop.permute.xlu1 %261  ;;  %v248_v47 = vpop.permute.xlu0 %247 }
  0xce   : > { %vm249_vm2 = vcmp.eq.s32.totalorder %v239_v42, %v248_v47  ;;  %vm250_vm3 = vcmp.eq.s32.totalorder %v240_v45, %v248_v47  ;;  %vm263_vm10 = vcmp.eq.s32.totalorder %v239_v42, %v262_v46  ;;  %vm264_vm12 = vcmp.eq.s32.totalorder %v240_v45, %v262_v46 }
  0xcf   : > { %vm251_vm4 = vmor %vm244_vm0, %vm249_vm2 }
  0xd0   : > { %vm252_vm5 = vmor %vm245_vm1, %vm250_vm3 }
  0xd1   : > { %vm258_vm8 = vmor %vm251_vm4, %vm256_vm6 }
  0xd2   : > { %v269_v48 = vpop.permute.xlu1 %268  ;;  %vm259_vm9 = vmor %vm252_vm5, %vm257_vm7  ;;  %v276_v49 = vpop.permute.xlu0 %275 }
  0xd3   : > { %vm270_vm11 = vcmp.eq.s32.totalorder %v239_v42, %v269_v48  ;;  %vm271_vm13 = vcmp.eq.s32.totalorder %v240_v45, %v269_v48  ;;  %vm265_vm14 = vmor %vm258_vm8, %vm263_vm10  ;;  %vm277_vm2 = vcmp.eq.s32.totalorder %v239_v42, %v276_v49  ;;  %vm278_vm3 = vcmp.eq.s32.totalorder %v240_v45, %v276_v49 }
  0xd4   : > { %vm266_vm15 = vmor %vm259_vm9, %vm264_vm12 }
  0xd5   : > { %vm272_vm0 = vmor %vm265_vm14, %vm270_vm11 }
  0xd6   : > { %vm273_vm1 = vmor %vm266_vm15, %vm271_vm13 }
  0xd7   : > { %v283_v50 = vpop.permute.xlu1 %282  ;;  %vm279_vm6 = vmor %vm272_vm0, %vm277_vm2 }
  0xd8   : > { %vm284_vm4 = vcmp.eq.s32.totalorder %v239_v42, %v283_v50  ;;  %vm285_vm5 = vcmp.eq.s32.totalorder %v240_v45, %v283_v50  ;;  %vm280_vm7 = vmor %vm273_vm1, %vm278_vm3 }
  0xd9   : > { %vm286_vm8 = vmor %vm279_vm6, %vm284_vm4 }
  0xda   : > { %vm287_vm12 = vmor %vm280_vm7, %vm285_vm5 }
  0xdc   : > { %v290_v51 = vpop.permute.xlu1 %289 }
  0xdd   : > { %vm291_vm10 = vcmp.eq.s32.totalorder %v239_v42, %v290_v51  ;;  %vm292_vm9 = vcmp.eq.s32.totalorder %v240_v45, %v290_v51 }
  0xde   : > { %vm293_vm11 = vmor %vm286_vm8, %vm291_vm10 }
  0xdf   : > { %vm294_vm14 = vmor %vm287_vm12, %vm292_vm9  ;;  %v532_v53 = vsel %vm293_vm11, 1.0, %v855_v52 }
  0xe0   : > { %v533_v54 = vsel %vm294_vm14, 1.0, %v855_v52 }
  0xe1   : > { %396 = vmatprep.mubr.f32.mxu0 %v533_v54 }
  0xe2   : > { %397 = vmatmul.mubr.f32.vlgmr.msra.gmra.mxu0 %v532_v53 }
 0x1a2   : > { %v570_v55 = vpop.f32.mrf.mxu0 }
 0x1a4   : > { %v571_v57 = vpop.f32.mrf.mxu0 }
 0x1a5   : > { %v572_v58 = vadd.f32 %v571_v57, %v570_v55 }
 0x1a7   : > { %v399_v59 = vadd.f32 %v572_v58, %v331_v56 }
 0x1a9   : > { %402 = vst [vmem:[%s236_s22] sm:$0xff] %v399_v59 }
 0x1aa   : > { %769 = shalt.err (!%p766_p5)
}
 0x1ab   : > { %s770_s10 = scalar_lea.hbm %s416_s6, 128  ;;  %s774_s26 = scalar_lea.hbm %s1058_s3, 256 }
 0x1ac   : > { %p771_p10 = scmp.ne.s32.totalorder %s416_s6, %s770_s10  ;;  %p775_p6 = scmp.lt.s32.totalorder %s416_s6, %s1058_s3 }
 0x1ad   : > { %p776_p12 = scmp.lt.s32.totalorder %s774_s26, %s770_s10 }
 0x1ae   : > { %p772_p1 = pnand %p771_p10, %p972_p7 }
 0x1af   : > { %p777_p3 = por %p776_p12, %p775_p6 }
 0x1b0   : > { %p773_p4 = pneg %p772_p1 }
 0x1b2   : > { %p778_p8 = pnand %p777_p3, %p773_p4 }
 0x1b4   : > { %781 = shalt.err (!%p778_p8)
}
 0x1b5   : > { %583 = dma.vmem_to_hbm [thread:$0]  (%p972_p7), %s419_s24, 128, %s416_s6, %s404_s7  }
 0x1b6 PF: > { %s430_s30 = sand.u32 1, %s820_s12   ;;  %p1072_p9 = scmp.ne.s32.totalorder %s1065_s23, 0 }
 0x1b7   : > { %p1073_p11 = scmp.ge.s32.totalorder %s840_s17, 2  ;;  %s431_s20 = scalar_lea.sflag [#allocation4], %s430_s30 }
 0x1b9   : > { %p597_p2 = pnand %p1073_p11, %p1072_p9 }
 0x1bb   : > { %p598_p13 = pneg %p597_p2 }
 0x1bd   : > { %815 = dma.done.wait (%p598_p13), %s431_s20, 128  }
 0x1be   : > { %817 = vsyncadd (%p598_p13), %s431_s20, 4294967168  ;;  %s20_s17 = sadd.s32 1, %s840_s17   ;;  %s1074_s12 = smov %s824_s13 }
 0x1bf   : > { %p17_p0 = scmp.ge.s32.totalorder %s20_s17, 4   ;;  %s1075_s13 = smov %s828_s14 }
 0x1c0   : > { %s1076_s14 = smov %s981_s29  ;;  %s1077_s15 = smov %s836_s16 }
 0x1c1   : > { %s1078_s16 = smov %s1080_s11  ;;  %19 = sbr.rel (!%p17_p0) target bundleno = 7 (0x7), region = 86 }
 0x1c6   :  { %436 = vsyncpa [#allocation3], 1 }
 0x1c7   :  { %438 = vsyncpa [#allocation3 + $0x1], 1 }
 0x1c8   :  { %439 = vsyncpa [#allocation6], 1 }
 0x1c9   :  { %440 = vsyncpa [#allocation4], 1 }
 0x1ca   :  { %442 = vsyncpa [#allocation4 + $0x1], 1 }

</bundles_post_ra>
